<compile_context>
chip_gen: v5e
topology: v5e:2x2
jax: 0.10.0
libtpu: 0.0.40
codegen_flags: <defaults>
</compile_context>

<pallas_src>
import jax
import jax.numpy as jnp
from jax import lax
from jax.experimental import pallas as pl
from jax.experimental.pallas import tpu as pltpu


_SMALL_C_MAX = 8                       # <= this: channel mix as full-width VPU FMAs
_VMEM_BUDGET = 12 * 1024 * 1024        # bytes for double-buffered (x, out) pair + weights
_VMEM_LIMIT = 32 * 1024 * 1024         # explicit scoped-VMEM limit (safe on v5e/v6e/v7x)


def _round_up(x, m):
    return (x + m - 1) // m * m


def _residual_pw_vpu_kernel(x_ref, w_ref, b_ref, o_ref):
    """Small-C path: C full-width (C, T) FMAs on the VPU.

    The residual identity is already folded into w (W + I).
      x_ref : (C, T) VMEM   channels on sublanes, pixels on lanes
      w_ref : (C, C) VMEM
      b_ref : (C, 1) VMEM
      o_ref : (C, T) VMEM
    """
    x = x_ref[...].astype(jnp.float32)          # (C, T)
    w = w_ref[...].astype(jnp.float32)          # (C, C)
    b = b_ref[...].astype(jnp.float32)          # (C, 1)
    c = x.shape[0]
    # (C,1) * (1,T) broadcasts to a full-width (C,T) FMA per input channel.
    acc = w[:, 0:1] * x[0:1, :] + b
    for ci in range(1, c):
        acc = acc + w[:, ci:ci + 1] * x[ci:ci + 1, :]
    o_ref[...] = acc.astype(o_ref.dtype)


def _residual_pw_mxu_kernel(x_ref, w_ref, b_ref, o_ref):
    """Large-C path: (C,C) @ (C,T) on the MXU, bias fused on the VPU.

    The residual identity is already folded into w (W + I).
      x_ref : (C, T) VMEM,  w_ref : (C, C) VMEM,  b_ref : (C, 1) VMEM
    """
    y = lax.dot_general(
        w_ref[...], x_ref[...],
        dimension_numbers=(((1,), (0,)), ((), ())),
        preferred_element_type=jnp.float32)
    o_ref[...] = (y + b_ref[...].astype(jnp.float32)).astype(o_ref.dtype)


def residual_pointwise(x_nchw, conv_w, conv_b):
    """Residual(Conv2d(C, C, kernel_size=1)) forward: conv1x1(x) + x.

    x_nchw : (N, C, H, W)
    conv_w : (C_out, C_in, 1, 1)   (PyTorch Conv2d weight layout)
    conv_b : (C_out,)
    Returns (N, C, H, W) in the input dtype.  No layout transposes, no padding.
    """
    N, C, H, W = x_nchw.shape
    HW = H * W
    dtype = x_nchw.dtype
    itemsize = jnp.dtype(dtype).itemsize

    # Fold the residual into the weight:  out = (W + I) @ x + b.
    w_eff = (conv_w[:, :, 0, 0] + jnp.eye(C, dtype=conv_w.dtype)).astype(dtype)
    b_eff = conv_b.reshape(C, 1).astype(dtype)
    w_itemsize = jnp.dtype(w_eff.dtype).itemsize

    # Free reshape: NCHW -> (N, C, H*W); pixels land on the lane axis.
    x3 = x_nchw.reshape(N, C, HW)

    # ---- tile sizing --------------------------------------------------
    # Per grid step VMEM: double-buffered x + out blocks (4*C*ct*itemsize)
    # plus the resident (C,C) weight / (C,1) bias blocks (counted 2x to be
    # safe).  Budget targets multi-MiB streaming blocks while staying under
    # the explicit 32 MiB scoped-VMEM limit on every generation.
    # TODO(synk): for very large C (>= ~1024 f32) add a K-tiling grid axis over
    # C_in with an accumulator instead of holding the full (C,C) weight.
    w_bytes = 2 * (C * C + C) * w_itemsize
    tile_budget = max(_VMEM_BUDGET - w_bytes, 512 * 1024)
    budget_ct = max(128, (tile_budget // (4 * C * itemsize)) // 128 * 128)

    if HW <= 128:
        ct = HW                                        # full extent, no (8,128) issue
    else:
        ct = min(budget_ct, max(128, (HW // 128) * 128))
        # Megacore (v7x has 2 TensorCores): keep >= ~4 parallel grid steps when
        # the input is large enough to split; only triggers for small tensors.
        while N * pl.cdiv(HW, ct) < 4 and ct > 128:
            ct = max(128, _round_up(ct // 2, 128))

    grid = (N, pl.cdiv(HW, ct))                        # ragged last tile -> masked store

    x_spec = pl.BlockSpec((None, C, ct), lambda n, j: (n, 0, j))
    o_spec = pl.BlockSpec((None, C, ct), lambda n, j: (n, 0, j))
    w_spec = pl.BlockSpec((C, C), lambda n, j: (0, 0))
    b_spec = pl.BlockSpec((C, 1), lambda n, j: (0, 0))

    kernel = _residual_pw_vpu_kernel if C <= _SMALL_C_MAX else _residual_pw_mxu_kernel

    cost = pl.CostEstimate(
        flops=2 * N * HW * C * C,
        transcendentals=0,
        bytes_accessed=2 * N * C * HW * itemsize + (C * C + C) * w_itemsize,
    )

    out3 = pl.pallas_call(
        kernel,
        out_shape=jax.ShapeDtypeStruct((N, C, HW), dtype),
        grid=grid,
        in_specs=[x_spec, w_spec, b_spec],
        out_specs=o_spec,
        compiler_params=pltpu.CompilerParams(
            dimension_semantics=("parallel", "parallel"),
            vmem_limit_bytes=_VMEM_LIMIT),
        cost_estimate=cost,
    )(x3, w_eff, b_eff)

    return out3.reshape(N, C, H, W)


if __name__ == "__main__":
    key = jax.random.PRNGKey(0)
    kx, kw, kb = jax.random.split(key, 3)

    # --- small-C (VPU) path -------------------------------------------
    N, C, H, W = 2, 4, 16, 16
    x = jax.random.normal(kx, (N, C, H, W), dtype=jnp.float32)
    conv_w = jax.random.normal(kw, (C, C, 1, 1), dtype=jnp.float32) * 0.1
    conv_b = jax.random.normal(kb, (C,), dtype=jnp.float32) * 0.1

    out = jax.block_until_ready(residual_pointwise(x, conv_w, conv_b))
    ref = (jnp.einsum("nchw,oc->nohw", x, conv_w[:, :, 0, 0])
           + conv_b[None, :, None, None] + x)
    assert out.shape == x.shape and out.dtype == x.dtype
    assert jnp.allclose(out, ref, atol=1e-5, rtol=1e-5)

    # --- larger-C (MXU) path with a ragged pixel count ------------------
    N2, C2, H2, W2 = 1, 32, 12, 15            # H*W = 180 -> masked tail tile
    k2x, k2w, k2b = jax.random.split(jax.random.PRNGKey(1), 3)
    x2 = jax.random.normal(k2x, (N2, C2, H2, W2), dtype=jnp.float32)
    w2 = jax.random.normal(k2w, (C2, C2, 1, 1), dtype=jnp.float32) * 0.1
    b2 = jax.random.normal(k2b, (C2,), dtype=jnp.float32) * 0.1

    out2 = jax.block_until_ready(residual_pointwise(x2, w2, b2))
    ref2 = (jnp.einsum("nchw,oc->nohw", x2, w2[:, :, 0, 0])
            + b2[None, :, None, None] + x2)
    assert jnp.allclose(out2, ref2, atol=1e-4, rtol=1e-4)

    print("KERNEL_OK")
</pallas_src>

<mosaic_0001>
module attributes {stable_mosaic.version = 11 : i64} {
  func.func @_residual_pw_vpu_kernel(%arg0: i32, %arg1: i32, %arg2: memref<1x4x128xf32, #tpu.memory_space<vmem>>, %arg3: memref<4x4xf32, #tpu.memory_space<vmem>>, %arg4: memref<4x1xf32, #tpu.memory_space<vmem>>, %arg5: memref<1x4x128xf32, #tpu.memory_space<vmem>>) attributes {dimension_semantics = [#tpu.dimension_semantics<parallel>, #tpu.dimension_semantics<parallel>], iteration_bounds = array<i64: 2, 2>, scalar_prefetch = 0 : i64, scratch_operands = 0 : i64, tpu.core_type = #tpu.core_type<tc>, window_params = [{transform_indices = @transform_0, window_bounds = array<i64: 1, 4, 128>}, {pipeline_mode = #tpu.pipeline_mode<synchronous>, transform_indices = @transform_1, window_bounds = array<i64: 4, 4>}, {pipeline_mode = #tpu.pipeline_mode<synchronous>, transform_indices = @transform_2, window_bounds = array<i64: 4, 1>}, {transform_indices = @transform_3, window_bounds = array<i64: 1, 4, 128>}]} {
    %c0 = arith.constant 0 : index
    %c0_0 = arith.constant 0 : index
    %c0_1 = arith.constant 0 : index
    %0 = vector.load %arg2[%c0, %c0_0, %c0_1] : memref<1x4x128xf32, #tpu.memory_space<vmem>>, vector<1x4x128xf32>
    %1 = vector.shape_cast %0 : vector<1x4x128xf32> to vector<4x128xf32>
    %c0_2 = arith.constant 0 : index
    %c0_3 = arith.constant 0 : index
    %2 = vector.load %arg3[%c0_2, %c0_3] : memref<4x4xf32, #tpu.memory_space<vmem>>, vector<4x4xf32>
    %c0_4 = arith.constant 0 : index
    %c0_5 = arith.constant 0 : index
    %3 = vector.load %arg4[%c0_4, %c0_5] : memref<4x1xf32, #tpu.memory_space<vmem>>, vector<4x1xf32>
    %4 = vector.extract_strided_slice %2 {offsets = [0, 0], sizes = [4, 1], strides = [1, 1]} : vector<4x4xf32> to vector<4x1xf32>
    %5 = vector.extract_strided_slice %1 {offsets = [0, 0], sizes = [1, 128], strides = [1, 1]} : vector<4x128xf32> to vector<1x128xf32>
    %6 = vector.broadcast %4 : vector<4x1xf32> to vector<4x128xf32>
    %7 = vector.broadcast %5 : vector<1x128xf32> to vector<4x128xf32>
    %8 = arith.mulf %6, %7 : vector<4x128xf32>
    %9 = vector.broadcast %3 : vector<4x1xf32> to vector<4x128xf32>
    %10 = arith.addf %8, %9 : vector<4x128xf32>
    %11 = vector.extract_strided_slice %2 {offsets = [0, 1], sizes = [4, 1], strides = [1, 1]} : vector<4x4xf32> to vector<4x1xf32>
    %12 = vector.extract_strided_slice %1 {offsets = [1, 0], sizes = [1, 128], strides = [1, 1]} : vector<4x128xf32> to vector<1x128xf32>
    %13 = vector.broadcast %11 : vector<4x1xf32> to vector<4x128xf32>
    %14 = vector.broadcast %12 : vector<1x128xf32> to vector<4x128xf32>
    %15 = arith.mulf %13, %14 : vector<4x128xf32>
    %16 = arith.addf %10, %15 : vector<4x128xf32>
    %17 = vector.extract_strided_slice %2 {offsets = [0, 2], sizes = [4, 1], strides = [1, 1]} : vector<4x4xf32> to vector<4x1xf32>
    %18 = vector.extract_strided_slice %1 {offsets = [2, 0], sizes = [1, 128], strides = [1, 1]} : vector<4x128xf32> to vector<1x128xf32>
    %19 = vector.broadcast %17 : vector<4x1xf32> to vector<4x128xf32>
    %20 = vector.broadcast %18 : vector<1x128xf32> to vector<4x128xf32>
    %21 = arith.mulf %19, %20 : vector<4x128xf32>
    %22 = arith.addf %16, %21 : vector<4x128xf32>
    %23 = vector.extract_strided_slice %2 {offsets = [0, 3], sizes = [4, 1], strides = [1, 1]} : vector<4x4xf32> to vector<4x1xf32>
    %24 = vector.extract_strided_slice %1 {offsets = [3, 0], sizes = [1, 128], strides = [1, 1]} : vector<4x128xf32> to vector<1x128xf32>
    %25 = vector.broadcast %23 : vector<4x1xf32> to vector<4x128xf32>
    %26 = vector.broadcast %24 : vector<1x128xf32> to vector<4x128xf32>
    %27 = arith.mulf %25, %26 : vector<4x128xf32>
    %28 = arith.addf %22, %27 : vector<4x128xf32>
    %c0_6 = arith.constant 0 : index
    %c0_7 = arith.constant 0 : index
    %c0_8 = arith.constant 0 : index
    %29 = vector.load %arg5[%c0_6, %c0_7, %c0_8] : memref<1x4x128xf32, #tpu.memory_space<vmem>>, vector<1x4x128xf32>
    %30 = vector.shape_cast %29 : vector<1x4x128xf32> to vector<4x128xf32>
    %31 = vector.shape_cast %28 : vector<4x128xf32> to vector<1x4x128xf32>
    tpu.vector_store %arg5[%c0_6, %c0_7, %c0_8], %31 {strides = array<i32>} : memref<1x4x128xf32, #tpu.memory_space<vmem>>, vector<1x4x128xf32>,
    return
  }
  func.func @transform_0(%arg0: i32, %arg1: i32) -> (i32, i32, i32) {
    %c0_i32 = arith.constant 0 : i32
    %c0_i32_0 = arith.constant 0 : i32
    return %arg0, %c0_i32, %arg1 : i32, i32, i32
  }
  func.func @transform_1(%arg0: i32, %arg1: i32) -> (i32, i32) {
    %c0_i32 = arith.constant 0 : i32
    %c0_i32_0 = arith.constant 0 : i32
    %c0_i32_1 = arith.constant 0 : i32
    return %c0_i32, %c0_i32_0 : i32, i32
  }
  func.func @transform_2(%arg0: i32, %arg1: i32) -> (i32, i32) {
    %c0_i32 = arith.constant 0 : i32
    %c0_i32_0 = arith.constant 0 : i32
    %c0_i32_1 = arith.constant 0 : i32
    return %c0_i32, %c0_i32_0 : i32, i32
  }
  func.func @transform_3(%arg0: i32, %arg1: i32) -> (i32, i32, i32) {
    %c0_i32 = arith.constant 0 : i32
    %c0_i32_0 = arith.constant 0 : i32
    return %arg0, %c0_i32, %arg1 : i32, i32, i32
  }
}

</mosaic_0001>

<bundles_post_ra>
// kernel: tpu_custom_call.1
= control target key start
LH: loop header
LB: loop body
LE: loop exit
PB: predicated region body
PF: predicated region fallthrough
CT: control target
= control target key end

     0   :  { %8 = vsyncpa [#allocation3], 0  ;;  %s755_s0 = inlined_call_operand.hbm [shape: f32[2,4,256], index: 0, kind: input, shape index: {}]   ;;  %s756_s1 = inlined_call_operand.vmem [shape: f32[4,4], index: 1, kind: input, shape index: {}]   ;;  %s757_s2 = inlined_call_operand.vmem [shape: f32[4,1], index: 2, kind: input, shape index: {}]   ;;  %s758_s3 = inlined_call_operand.hbm [shape: f32[2,4,256], index: 3, kind: output, shape index: {}]  }
   0x1   :  { %10 = vsyncpa [#allocation3 + $0x1], 0 }
   0x2   :  { %11 = vsyncpa [#allocation4], 0 }
   0x3   :  { %13 = vsyncpa [#allocation4 + $0x1], 0  ;;  %s603_s12 = smov 0   ;;  %s605_s13 = smov 0  }
   0x4   :  { %s607_s14 = smov 0   ;;  %s609_s15 = smov 0  }
   0x5   :  { %s611_s16 = smov 0   ;;  %s613_s17 = smov 0  }
   0x6   :  { %s615_s18 = smov 0   ;;  %s617_s19 = smov 0  }
   0x7 LB: > { %s347_s20 = sadd.s32 4294967295, %s577_s19   ;;  %s348_s21 = sadd.s32 4294967294, %s577_s19   ;;  %s577_s19 = sphi %s617_s19, %s19_s19   ;;  %s573_s18 = sphi %s615_s18, %s772_s18   ;;  %s569_s17 = sphi %s613_s17, %s771_s17   ;;  %s565_s16 = sphi %s611_s16, %s770_s16   ;;  %s561_s15 = sphi %s609_s15, %s769_s15   ;;  %s557_s14 = sphi %s607_s14, %s768_s14   ;;  %s553_s13 = sphi %s605_s13, %s767_s13   ;;  %s549_s12 = sphi %s603_s12, %s766_s12  }
   0x8   : > { %s28_s22 = sadd.s32 1, %s569_s17  ;;  %s31_s23 = sadd.s32 1, %s573_s18 }
   0x9   : > { %p29_p0 = scmp.ge.s32.totalorder %s28_s22, 2  ;;  %s40_s24 = sadd.s32 1, %s557_s14 }
   0xa   : > { %p47_p1 = scmp.ne.s32.totalorder %s557_s14, %s553_s13  ;;  %p48_p2 = scmp.eq.s32.totalorder %s577_s19, 0 }
   0xb   : > { %s774_s22 = smov (%p29_p0, %s28_s22), 0  ;;  %s776_s23 = smov (!%p29_p0, %s31_s23), %s573_s18 }
   0xc   : > { %s36_s25 = ssub.s32 %s569_s17, %s774_s22  ;;  %p656_p3 = por %p48_p2, %p47_p1 }
   0xd   : > { %p33_p4 = scmp.ge.s32.totalorder %s776_s23, 2  ;;  %p53_p5 = scmp.ne.s32.totalorder %s553_s13, %s549_s12 }
   0xe   : > { %p54_p6 = scmp.eq.s32.totalorder %s347_s20, 0  ;;  %p121_p7 = scmp.eq.s32.totalorder %s347_s20, 3 }
   0xf   : > { %s778_s23 = smov (%p33_p4, %s776_s23), 0  ;;  %p127_p10 = scmp.eq.s32.totalorder %s348_s21, 3 }
  0x10   : > { %761 = sst [smem:[#allocation8_spill]] %s778_s23  ;;  %p664_p8 = por %p54_p6, %p53_p5 }
  0x11   : > { %p668_p9 = por %p121_p7, %p47_p1  ;;  %s35_s29 = ssub.s32 %s573_s18, %s778_s23 }
  0x12   : > { %s37_s30 = sor.u32 %s36_s25, %s35_s29  ;;  %p674_p12 = por %p127_p10, %p53_p5 }
  0x13   : > { %p38_p11 = scmp.eq.s32.totalorder %s37_s30, 0  ;;  %p374_p13 = scmp.lt.s32.totalorder %s577_s19, 4 }
  0x14   : > { %s153_s5 = sand.u32 1, %s557_s14   ;;  %s352_s8 = sshll.u32 %s573_s18, 1 }
  0x15   : > { %s681_s6 = scalar_select %p38_p11, %s557_s14, %s40_s24  }
  0x16   : > { %s351_s7 = sshll.u32 %s153_s5, 2  ;;  %s161_s9 = sadd.s32 %s569_s17, %s352_s8 }
  0x17   : > { %s157_s10 = scalar_lea.vmem [#allocation2], %s351_s7  ;;  %s353_s20 = sshll.u32 %s161_s9, 2 }
  0x18   : > { %s167_s11 = sshll.u32 %s157_s10, 4  ;;  %s163_s29 = scalar_lea.hbm %s755_s0, %s353_s20  ;;  %s168_s11 = int_to_ptr.vmem [resolvable:$true] %s167_s11 }
  0x19   : > { %p367_p0 = pnand %p374_p13, %p656_p3  ;;  %s165_s30 = sshll.u32 %s163_s29, 4  ;;  %s166_s30 = int_to_ptr.hbm [resolvable:$true] %s165_s30 }
  0x1a   : > { %p354_p1 = scmp.ge.s32.totalorder %s577_s19, 1  ;;  %s154_s23 = scalar_lea.sflag [#allocation3], %s153_s5 }
  0x1b   : > { %369 = dma.hbm_to_vmem [thread:$0]  (!%p367_p0), %s166_s30, 64, %s168_s11, %s154_s23  }
  0x1c   : > { %p172_p2 = scmp.lt.s32.totalorder %s577_s19, 5 }
  0x1e   : > { %p173_p4 = pnand %p354_p1, %p172_p2 }
  0x1f   : > { %s693_s24 = sand.u32 (!%p173_p4), 1, %s553_s13  }
  0x20   : > { %176 = sbr.rel (%p173_p4) target bundleno = 174 (0xae), region = 32  ;;  %s355_s7 = sshll.u32 (!%p173_p4), %s693_s24, 2 }
  0x21   : > { %s179_s8 = scalar_lea.sflag (!%p173_p4), [#allocation3], %s693_s24  ;;  %s182_s26 = scalar_lea.vmem (!%p173_p4), [#allocation2], %s355_s7 }
  0x25   : > { %540 = dma.done.wait (%p664_p8), %s179_s8, 64  }
  0x26   : > { %542 = vsyncadd (%p664_p8), %s179_s8, 4294967232  ;;  %v579_v0 = vmov 0   ;;  %v580_v1 = vmov 1   ;;  %v581_v2 = vmov 3   ;;  %v207_v3 = vld [vmem:[%s756_s1] sm:$0xf] }
  0x27   : > { %444 = vset.pattern.permute.xlu0 %v579_v0  ;;  %445 = vset.pattern.permute.xlu1 %v580_v1  ;;  %v208_v4 = vld [vmem:[%s757_s2] sm:$0xf]  ;;  %v582_v5 = vmov 2   ;;  %s358_s27 = sshll.u32 %s565_s16, 1  ;;  %s245_s8 = scalar_lea.sflag [#allocation4], %s693_s24 }
  0x28   : > { %447 = vset.pattern.permute.xlu2 %v581_v2  ;;  %211 = vperm.xlu0 %444, %v207_v3   ;;  %v206_v7 = vld [vmem:[%s182_s26] sm:$0xf]  ;;  %s255_s11 = sadd.s32 %s561_s15, %s358_s27  ;;  %s205_s15 = scalar_lea.vmem [#allocation5], %s355_s7 }
  0x29   : > { %223 = vperm.xlu1 %445, %v207_v3   ;;  %237 = vperm.xlu2 %447, %v207_v3   ;;  %v214_v9 = vperm.slane %v206_v7, 0  ;;  %v226_v10 = vperm.slane %v206_v7, 1  ;;  %v233_v11 = vperm.slane %v206_v7, 2  ;;  %s359_s20 = sshll.u32 %s255_s11, 2  ;;  %v240_v13 = vperm.slane %v206_v7, 3  ;;  %s259_s16 = sshll.u32 %s205_s15, 4  ;;  %s260_s16 = int_to_ptr.vmem [resolvable:$true] %s259_s16 }
  0x2a   : > { %s257_s29 = scalar_lea.hbm %s758_s3, %s359_s20  ;;  %s499_s10 = scalar_lea.hbm %s758_s3, 16 }
  0x2b   : > { %s261_s30 = sshll.u32 %s257_s29, 4  ;;  %s262_s30 = int_to_ptr.hbm [resolvable:$true] %s261_s30 }
  0x2c   : > { %s493_s26 = sshra.s32 %s262_s30, 4  ;;  %s494_s26 = int_to_ptr.hbm [resolvable:$true] %s493_s26 }
  0x2d   : > { %s495_s23 = scalar_lea.hbm %s494_s26, 4  ;;  %p500_p7 = scmp.lt.s32.totalorder %s494_s26, %s758_s3 }
  0x2e   : > { %p496_p3 = scmp.ne.s32.totalorder %s494_s26, %s495_s23  ;;  %p501_p8 = scmp.lt.s32.totalorder %s499_s10, %s495_s23 }
  0x30   : > { %218 = vperm.xlu0 %444, %v208_v4   ;;  %p497_p5 = pnand %p496_p3, %p668_p9  ;;  %p502_p10 = por %p501_p8, %p500_p7 }
  0x31   : > { %446 = vset.pattern.permute.xlu1 %v582_v5 }
  0x32   : > { %230 = vperm.xlu1 %446, %v207_v3   ;;  %p498_p6 = pneg %p497_p5 }
  0x34   : > { %p503_p11 = pnand %p502_p10, %p498_p6 }
  0x38   : > { %448 = vset.pattern.permute.xlu0 %v581_v2 }
  0x83   : > { %v238_v15 = vpop.permute.xlu2 %237 }
  0x84   : > { %v241_v21 = vmul.f32 %v240_v13, %v238_v15 }
  0x9a   : > { %v212_v6 = vpop.permute.xlu0 %211 }
  0x9b   : > { %v224_v8 = vpop.permute.xlu1 %223  ;;  %v215_v12 = vmul.f32 %v214_v9, %v212_v6 }
  0x9c   : > { %v227_v16 = vmul.f32 %v226_v10, %v224_v8 }
  0xa2   : > { %v219_v14 = vpop.permute.xlu0 %218 }
  0xa3   : > { %v221_v17 = vadd.f32 %v219_v14, %v215_v12 }
  0xa4   : > { %v231_v18 = vpop.permute.xlu1 %230 }
  0xa5   : > { %v234_v19 = vmul.f32 %v233_v11, %v231_v18  ;;  %v228_v20 = vadd.f32 %v227_v16, %v221_v17 }
  0xa7   : > { %v235_v22 = vadd.f32 %v234_v19, %v228_v20 }
  0xa9   : > { %v242_v23 = vadd.f32 %v241_v21, %v235_v22 }
  0xab   : > { %243 = vst [vmem:[%s205_s15] sm:$0xf] %v242_v23 }
  0xac   : > { %506 = shalt.err (!%p503_p11)
}
  0xad   : > { %364 = dma.vmem_to_hbm [thread:$0]  (%p668_p9), %s260_s16, 64, %s262_s30, %s245_s8  }
  0xae PF: > { %p375_p13 = scmp.ge.s32.totalorder %s577_s19, 2  ;;  %s273_s24 = sand.u32 1, %s549_s12  }
  0xaf   : > { %s274_s11 = scalar_lea.sflag [#allocation4], %s273_s24 }
  0xb0   : > { %p371_p0 = pnand %p375_p13, %p674_p12 }
  0xb2   : > { %p372_p1 = pneg %p371_p0 }
  0xb4   : > { %544 = dma.done.wait (%p372_p1), %s274_s11, 64  }
  0xb5   : > { %546 = vsyncadd (%p372_p1), %s274_s11, 4294967232  ;;  %s19_s19 = sadd.s32 1, %s577_s19   ;;  %s765_s28 = sld [smem:[#allocation8_spill]] }
  0xb6   : > { %p16_p2 = scmp.ge.s32.totalorder %s19_s19, 6   ;;  %s766_s12 = smov %s553_s13 }
  0xb7   : > { %s767_s13 = smov %s557_s14  ;;  %s768_s14 = smov %s681_s6 }
  0xb8   : > { %s769_s15 = smov %s569_s17  ;;  %s770_s16 = smov %s573_s18 }
  0xb9   : > { %s771_s17 = smov %s774_s22  ;;  %18 = sbr.rel (!%p16_p2) target bundleno = 7 (0x7), region = 77 }
  0xbb   : > { %s772_s18 = smov %s765_s28 }
  0xbe   :  { %280 = vsyncpa [#allocation3], 1 }
  0xbf   :  { %282 = vsyncpa [#allocation3 + $0x1], 1 }
  0xc0   :  { %283 = vsyncpa [#allocation4], 1 }
  0xc1   :  { %285 = vsyncpa [#allocation4 + $0x1], 1 }

</bundles_post_ra>
